<compile_context>
chip_gen: v6e
topology: v6e:2x2x1
jax: 0.10.0
libtpu: 0.0.40
codegen_flags: <defaults>
</compile_context>

<pallas_src>
import functools
import math

import jax
import jax.numpy as jnp
from jax import lax
from jax.experimental import pallas as pl
from jax.experimental.pallas import tpu as pltpu


def _round_up(x, m):
    return ((x + m - 1) // m) * m


def _vmem_usable_bytes():
    """Usable VMEM budget with headroom for Mosaic internal scratch/semaphores.
    v5e/v6e: 128 MiB physical -> ~100 MiB; v7x: 64 MiB/TC -> ~48 MiB."""
    cap = 64 * 1024 * 1024  # conservative default (v7x per-TC)
    try:
        info = pltpu.get_tpu_info()
        cap = int(getattr(info, "vmem_capacity_bytes", cap) or cap)
    except Exception:
        pass
    usable = min(cap - 16 * 1024 * 1024, int(cap * 0.78))
    return max(usable, 32 * 1024 * 1024)


# --------------------------------------------------------------------------
# Kernel A: full weights resident in VMEM, grid over token tiles only.
# --------------------------------------------------------------------------
def _ffn_resident_kernel(x_ref, w1_ref, b1_ref, w2_ref, b2_ref, o_ref,
                         acc_ref, *, tk):
    # x_ref:  (tm, d_model_p)      token tile (compute dtype, e.g. bf16)
    # w1_ref: (d_model_p, d_ff_p)  full W1 (constant index_map -> DMA'd once)
    # b1_ref: (1, d_ff_p)          f32
    # w2_ref: (d_ff_p, d_model_p)  full W2
    # b2_ref: (1, d_model_p)       f32
    # o_ref:  (tm, d_model_p)      output tile (x.dtype)
    # acc_ref:(tm, d_model_p)      f32 accumulator scratch
    acc_ref[...] = jnp.broadcast_to(
        b2_ref[...].astype(jnp.float32), acc_ref.shape)
    x = x_ref[...]
    n_k = w1_ref.shape[1] // tk  # static

    def body(k, carry):
        off = pl.multiple_of(k * tk, tk)
        # (tm, tk) f32 intermediate is staged in VMEM; bounded by tk.
        h = jnp.dot(x, w1_ref[:, pl.ds(off, tk)],
                    preferred_element_type=jnp.float32)
        h = jnp.maximum(h + b1_ref[:, pl.ds(off, tk)].astype(jnp.float32), 0.0)
        # TODO(synk): dropout is identity at inference; training-mode dropout
        # would use pltpu.prng_seed + pltpu.stateful_bernoulli on `h` here.
        acc_ref[...] += jnp.dot(h.astype(w2_ref.dtype),
                                w2_ref[pl.ds(off, tk), :],
                                preferred_element_type=jnp.float32)
        return carry

    lax.fori_loop(0, n_k, body, None, unroll=n_k <= 8)
    o_ref[...] = acc_ref[...].astype(o_ref.dtype)


# --------------------------------------------------------------------------
# Kernel B: weights streamed per k slab, reduction-last grid (fallback).
# --------------------------------------------------------------------------
def _ffn_stream_kernel(x_ref, w1_ref, b1_ref, w2_ref, b2_ref, o_ref, acc_ref):
    # x_ref:  (tm, d_model_p)      token tile
    # w1_ref: (d_model_p, tk)      k-th column slab of W1
    # b1_ref: (1, tk)              f32
    # w2_ref: (tk, d_model_p)      k-th row slab of W2
    # b2_ref: (1, d_model_p)       f32
    # o_ref:  (tm, d_model_p)      output tile
    # acc_ref:(tm, d_model_p)      f32 accumulator, resident across k
    k = pl.program_id(1)

    @pl.when(k == 0)
    def _():
        acc_ref[...] = jnp.broadcast_to(
            b2_ref[...].astype(jnp.float32), acc_ref.shape)

    # (tm, tk) f32 intermediate (staged in VMEM, budgeted by the wrapper).
    h = jnp.dot(x_ref[...], w1_ref[...], preferred_element_type=jnp.float32)
    h = jnp.maximum(h + b1_ref[...].astype(jnp.float32), 0.0)
    acc_ref[...] += jnp.dot(h.astype(w2_ref.dtype), w2_ref[...],
                            preferred_element_type=jnp.float32)

    @pl.when(k == pl.num_programs(1) - 1)
    def _():
        o_ref[...] = acc_ref[...].astype(o_ref.dtype)


def positionwise_feed_forward(x, w1, b1, w2, b2, *,
                              tm=None, tk_ff=512,
                              compute_dtype=jnp.bfloat16,
                              force_streaming=False):
    """x: (B, S, d_model). w1: (d_model, d_ff), b1: (d_ff,),
    w2: (d_ff, d_model), b2: (d_model,). Returns (B, S, d_model)."""
    B, S, d_model = x.shape
    d_ff = w1.shape[1]
    M = B * S
    out_dtype = x.dtype
    c_sz = jnp.dtype(compute_dtype).itemsize
    o_sz = jnp.dtype(out_dtype).itemsize

    # ---- lane-dense padding; tk divides d_ff_p (no zero-work tail step) ----
    d_model_p = _round_up(d_model, 128)
    d_ff_p = _round_up(d_ff, 128)
    tk = min(_round_up(min(tk_ff, d_ff_p), 128), d_ff_p)
    while d_ff_p % tk:
        tk -= 128

    usable = _vmem_usable_bytes()

    # ---- token tile: high arithmetic intensity, >= 2 tiles for v7x 2xTC ----
    target_tm = 1024 if tm is None else tm
    if M <= 256:
        tm_eff = max(16, _round_up(M, 16))   # sublane-aligned small case
    else:
        half = max(256, ((M // 2) // 256) * 256)
        tm_eff = max(256, min(target_tm, half))

    def budgets(tm_):
        h_bytes = tm_ * tk * (4 + c_sz)                 # f32 h + bf16 cast copy
        io_bytes = 2 * tm_ * d_model_p * (c_sz + o_sz)  # x/out double-buffered
        acc_bytes = tm_ * d_model_p * 4
        w_full = 2 * d_model_p * d_ff_p * c_sz          # W1 + W2 (padded, bf16)
        resident = (io_bytes + acc_bytes + h_bytes
                    + 2 * w_full                        # allow 2x buffer alloc
                    + 2 * (d_ff_p + d_model_p) * 4)
        streaming = (io_bytes + acc_bytes + h_bytes
                     + 4 * d_model_p * tk * c_sz        # W1/W2 slabs, 2x buf
                     + 2 * (tk + d_model_p) * 4)
        return resident, streaming

    use_resident = False
    if not force_streaming:
        tm_try = tm_eff
        while True:
            if budgets(tm_try)[0] <= usable:
                use_resident, tm_eff = True, tm_try
                break
            if tm_try <= 256:
                break
            tm_try = max(256, tm_try // 2)
    if not use_resident:
        while budgets(tm_eff)[1] > usable and tm_eff > 256:
            tm_eff = max(256, tm_eff // 2)

    M_p = _round_up(M, tm_eff)
    n_i = M_p // tm_eff

    # ---- pad operands (zeros are exact: padded rows/cols contribute 0) ----
    x2d = x.reshape(M, d_model).astype(compute_dtype)
    x2d = jnp.pad(x2d, ((0, M_p - M), (0, d_model_p - d_model)))
    w1_p = jnp.pad(w1.astype(compute_dtype),
                   ((0, d_model_p - d_model), (0, d_ff_p - d_ff)))
    w2_p = jnp.pad(w2.astype(compute_dtype),
                   ((0, d_ff_p - d_ff), (0, d_model_p - d_model)))
    b1_p = jnp.pad(b1.astype(jnp.float32), (0, d_ff_p - d_ff)).reshape(1, d_ff_p)
    b2_p = jnp.pad(b2.astype(jnp.float32),
                   (0, d_model_p - d_model)).reshape(1, d_model_p)

    flops = 4 * M * d_model * d_ff  # two matmuls

    if use_resident:
        vmem_limit = int(min(usable,
                             max(32 * 1024 * 1024, budgets(tm_eff)[0] * 1.15)))
        cost = pl.CostEstimate(
            flops=flops, transcendentals=0,
            bytes_accessed=(M * d_model * (c_sz + o_sz)
                            + 2 * d_model * d_ff * c_sz     # weights read once
                            + (d_ff + d_model) * 4))
        out = pl.pallas_call(
            functools.partial(_ffn_resident_kernel, tk=tk),
            out_shape=jax.ShapeDtypeStruct((M_p, d_model_p), out_dtype),
            grid_spec=pltpu.PrefetchScalarGridSpec(
                num_scalar_prefetch=0,
                grid=(n_i,),
                in_specs=[
                    pl.BlockSpec((tm_eff, d_model_p), lambda i: (i, 0)),
                    pl.BlockSpec((d_model_p, d_ff_p), lambda i: (0, 0)),
                    pl.BlockSpec((1, d_ff_p), lambda i: (0, 0)),
                    pl.BlockSpec((d_ff_p, d_model_p), lambda i: (0, 0)),
                    pl.BlockSpec((1, d_model_p), lambda i: (0, 0)),
                ],
                out_specs=pl.BlockSpec((tm_eff, d_model_p), lambda i: (i, 0)),
                scratch_shapes=[pltpu.VMEM((tm_eff, d_model_p), jnp.float32)],
            ),
            compiler_params=pltpu.CompilerParams(
                dimension_semantics=("parallel",),
                vmem_limit_bytes=vmem_limit,
            ),
            cost_estimate=cost,
        )(x2d, w1_p, b1_p, w2_p, b2_p)
    else:
        # NOTE: if DMA is still exposed at large tm, add
        # pipeline_mode=pl.Buffered(3) on the W1/W2 slab BlockSpecs.
        vmem_limit = int(min(usable,
                             max(32 * 1024 * 1024, budgets(tm_eff)[1] * 1.25)))
        cost = pl.CostEstimate(
            flops=flops, transcendentals=0,
            bytes_accessed=(M * d_model * (c_sz + o_sz)
                            + 2 * d_model * d_ff * c_sz * n_i  # restreamed/tile
                            + (d_ff + d_model) * 4 * n_i))
        out = pl.pallas_call(
            _ffn_stream_kernel,
            out_shape=jax.ShapeDtypeStruct((M_p, d_model_p), out_dtype),
            grid_spec=pltpu.PrefetchScalarGridSpec(
                num_scalar_prefetch=0,
                grid=(n_i, d_ff_p // tk),
                in_specs=[
                    pl.BlockSpec((tm_eff, d_model_p), lambda i, k: (i, 0)),
                    pl.BlockSpec((d_model_p, tk), lambda i, k: (0, k)),
                    pl.BlockSpec((1, tk), lambda i, k: (0, k)),
                    pl.BlockSpec((tk, d_model_p), lambda i, k: (k, 0)),
                    pl.BlockSpec((1, d_model_p), lambda i, k: (0, 0)),
                ],
                out_specs=pl.BlockSpec((tm_eff, d_model_p), lambda i, k: (i, 0)),
                scratch_shapes=[pltpu.VMEM((tm_eff, d_model_p), jnp.float32)],
            ),
            compiler_params=pltpu.CompilerParams(
                dimension_semantics=("parallel", "arbitrary"),
                vmem_limit_bytes=vmem_limit,
            ),
            cost_estimate=cost,
        )(x2d, w1_p, b1_p, w2_p, b2_p)

    return out[:M, :d_model].reshape(B, S, d_model)


def _init_linear_params(key, in_features, out_features, dtype=jnp.float32):
    """Deterministic nn.Linear-style init: U(-1/sqrt(fan_in), 1/sqrt(fan_in)).
    Returns weight already transposed to (in_features, out_features)."""
    kw, kb = jax.random.split(key)
    bound = 1.0 / math.sqrt(in_features)
    w = jax.random.uniform(kw, (in_features, out_features), dtype,
                           minval=-bound, maxval=bound)
    b = jax.random.uniform(kb, (out_features,), dtype,
                           minval=-bound, maxval=bound)
    return w, b


if __name__ == "__main__":
    # Small shapes consistent with the module: batch=2, seq=8, d_model=32, d_ff=64.
    B, S, d_model, d_ff = 2, 8, 32, 64

    key = jax.random.PRNGKey(0)
    kx, k1, k2 = jax.random.split(key, 3)

    x = jax.random.normal(kx, (B, S, d_model), jnp.float32)
    w1, b1 = _init_linear_params(k1, d_model, d_ff)
    w2, b2 = _init_linear_params(k2, d_ff, d_model)

    # Pure-JAX reference with the same bf16-operand / f32-accumulate recipe
    # (dropout = identity at inference).
    xb, w1b, w2b = (a.astype(jnp.bfloat16) for a in (x, w1, w2))
    h_ref = jnp.maximum(
        jnp.dot(xb, w1b, preferred_element_type=jnp.float32) + b1, 0.0)
    y_ref = (jnp.dot(h_ref.astype(jnp.bfloat16), w2b,
                     preferred_element_type=jnp.float32) + b2).astype(x.dtype)

    # Default (weight-resident) path and the streaming fallback path.
    y_res = jax.block_until_ready(positionwise_feed_forward(x, w1, b1, w2, b2))
    y_str = jax.block_until_ready(
        positionwise_feed_forward(x, w1, b1, w2, b2, force_streaming=True))

    assert y_res.shape == (B, S, d_model)
    assert jnp.allclose(y_res, y_ref, atol=1e-2, rtol=1e-2), (
        float(jnp.max(jnp.abs(y_res - y_ref))))
    assert jnp.allclose(y_str, y_ref, atol=1e-2, rtol=1e-2), (
        float(jnp.max(jnp.abs(y_str - y_ref))))

    print("KERNEL_OK")
</pallas_src>

<mosaic_0001>
module attributes {stable_mosaic.version = 11 : i64} {
  func.func @_ffn_resident_kernel(%arg0: i32, %arg1: memref<16x128xbf16, #tpu.memory_space<vmem>>, %arg2: memref<128x128xbf16, #tpu.memory_space<vmem>>, %arg3: memref<1x128xf32, #tpu.memory_space<vmem>>, %arg4: memref<128x128xbf16, #tpu.memory_space<vmem>>, %arg5: memref<1x128xf32, #tpu.memory_space<vmem>>, %arg6: memref<16x128xf32, #tpu.memory_space<vmem>>, %arg7: memref<16x128xf32, #tpu.memory_space<vmem>>) attributes {dimension_semantics = [#tpu.dimension_semantics<parallel>], iteration_bounds = array<i64: 1>, scalar_prefetch = 0 : i64, scratch_operands = 1 : i64, tpu.core_type = #tpu.core_type<tc>, window_params = [{transform_indices = @transform_0, window_bounds = array<i64: 16, 128>}, {pipeline_mode = #tpu.pipeline_mode<synchronous>, transform_indices = @transform_1, window_bounds = array<i64: 128, 128>}, {pipeline_mode = #tpu.pipeline_mode<synchronous>, transform_indices = @transform_2, window_bounds = array<i64: 1, 128>}, {pipeline_mode = #tpu.pipeline_mode<synchronous>, transform_indices = @transform_3, window_bounds = array<i64: 128, 128>}, {pipeline_mode = #tpu.pipeline_mode<synchronous>, transform_indices = @transform_4, window_bounds = array<i64: 1, 128>}, {transform_indices = @transform_5, window_bounds = array<i64: 16, 128>}]} {
    %c0 = arith.constant 0 : index
    %c0_0 = arith.constant 0 : index
    %0 = vector.load %arg5[%c0, %c0_0] : memref<1x128xf32, #tpu.memory_space<vmem>>, vector<1x128xf32>
    %1 = vector.shape_cast %0 : vector<1x128xf32> to vector<1x128xf32>
    %2 = vector.broadcast %1 : vector<1x128xf32> to vector<16x128xf32>
    %c0_1 = arith.constant 0 : index
    %c0_2 = arith.constant 0 : index
    %3 = vector.load %arg7[%c0_1, %c0_2] : memref<16x128xf32, #tpu.memory_space<vmem>>, vector<16x128xf32>
    tpu.vector_store %arg7[%c0_1, %c0_2], %2 {strides = array<i32>} : memref<16x128xf32, #tpu.memory_space<vmem>>, vector<16x128xf32>,
    %c0_3 = arith.constant 0 : index
    %c0_4 = arith.constant 0 : index
    %4 = vector.load %arg1[%c0_3, %c0_4] : memref<16x128xbf16, #tpu.memory_space<vmem>>, vector<16x128xbf16>
    %c0_i32 = arith.constant 0 : i32
    %c128_i32 = arith.constant 128 : i32
    %5 = arith.muli %c0_i32, %c128_i32 : i32
    %6 = tpu.assume_multiple %5, 128 : i32
    %c0_5 = arith.constant 0 : index
    %7 = arith.index_cast %6 : i32 to index
    %8 = vector.load %arg2[%c0_5, %7] : memref<128x128xbf16, #tpu.memory_space<vmem>>, vector<128x128xbf16>
    %cst = arith.constant dense<0.000000e+00> : vector<16x128xf32>
    %9 = tpu.matmul %4, %8, %cst {dimension_numbers = #tpu.dot_dimension_numbers<[1], [0], [0], [1], [0, 0, 1, 1], [], []>} : vector<16x128xbf16>, vector<128x128xbf16>, vector<16x128xf32> -> vector<16x128xf32>
    %c0_6 = arith.constant 0 : index
    %10 = arith.index_cast %6 : i32 to index
    %11 = vector.load %arg3[%c0_6, %10] : memref<1x128xf32, #tpu.memory_space<vmem>>, vector<1x128xf32>
    %12 = vector.broadcast %11 : vector<1x128xf32> to vector<16x128xf32>
    %13 = arith.addf %9, %12 : vector<16x128xf32>
    %cst_7 = arith.constant 0.000000e+00 : f32
    %14 = vector.broadcast %cst_7 : f32 to vector<16x128xf32>
    %15 = arith.maximumf %13, %14 : vector<16x128xf32>
    %c0_8 = arith.constant 0 : index
    %c0_9 = arith.constant 0 : index
    %16 = vector.load %arg7[%c0_8, %c0_9] : memref<16x128xf32, #tpu.memory_space<vmem>>, vector<16x128xf32>
    %17 = arith.truncf %15 : vector<16x128xf32> to vector<16x128xbf16>
    %18 = arith.index_cast %6 : i32 to index
    %c0_10 = arith.constant 0 : index
    %19 = vector.load %arg4[%18, %c0_10] : memref<128x128xbf16, #tpu.memory_space<vmem>>, vector<128x128xbf16>
    %cst_11 = arith.constant dense<0.000000e+00> : vector<16x128xf32>
    %20 = tpu.matmul %17, %19, %cst_11 {dimension_numbers = #tpu.dot_dimension_numbers<[1], [0], [0], [1], [0, 0, 1, 1], [], []>} : vector<16x128xbf16>, vector<128x128xbf16>, vector<16x128xf32> -> vector<16x128xf32>
    %21 = arith.addf %16, %20 : vector<16x128xf32>
    %c0_12 = arith.constant 0 : index
    %c0_13 = arith.constant 0 : index
    %22 = vector.load %arg7[%c0_12, %c0_13] : memref<16x128xf32, #tpu.memory_space<vmem>>, vector<16x128xf32>
    tpu.vector_store %arg7[%c0_12, %c0_13], %21 {strides = array<i32>} : memref<16x128xf32, #tpu.memory_space<vmem>>, vector<16x128xf32>,
    %c1_i32 = arith.constant 1 : i32
    %c0_14 = arith.constant 0 : index
    %c0_15 = arith.constant 0 : index
    %23 = vector.load %arg7[%c0_14, %c0_15] : memref<16x128xf32, #tpu.memory_space<vmem>>, vector<16x128xf32>
    %c0_16 = arith.constant 0 : index
    %c0_17 = arith.constant 0 : index
    %24 = vector.load %arg6[%c0_16, %c0_17] : memref<16x128xf32, #tpu.memory_space<vmem>>, vector<16x128xf32>
    tpu.vector_store %arg6[%c0_16, %c0_17], %23 {strides = array<i32>} : memref<16x128xf32, #tpu.memory_space<vmem>>, vector<16x128xf32>,
    return
  }
  func.func @transform_0(%arg0: i32) -> (i32, i32) {
    %c0_i32 = arith.constant 0 : i32
    %c0_i32_0 = arith.constant 0 : i32
    return %arg0, %c0_i32 : i32, i32
  }
  func.func @transform_1(%arg0: i32) -> (i32, i32) {
    %c0_i32 = arith.constant 0 : i32
    %c0_i32_0 = arith.constant 0 : i32
    %c0_i32_1 = arith.constant 0 : i32
    return %c0_i32, %c0_i32_0 : i32, i32
  }
  func.func @transform_2(%arg0: i32) -> (i32, i32) {
    %c0_i32 = arith.constant 0 : i32
    %c0_i32_0 = arith.constant 0 : i32
    %c0_i32_1 = arith.constant 0 : i32
    return %c0_i32, %c0_i32_0 : i32, i32
  }
  func.func @transform_3(%arg0: i32) -> (i32, i32) {
    %c0_i32 = arith.constant 0 : i32
    %c0_i32_0 = arith.constant 0 : i32
    %c0_i32_1 = arith.constant 0 : i32
    return %c0_i32, %c0_i32_0 : i32, i32
  }
  func.func @transform_4(%arg0: i32) -> (i32, i32) {
    %c0_i32 = arith.constant 0 : i32
    %c0_i32_0 = arith.constant 0 : i32
    %c0_i32_1 = arith.constant 0 : i32
    return %c0_i32, %c0_i32_0 : i32, i32
  }
  func.func @transform_5(%arg0: i32) -> (i32, i32) {
    %c0_i32 = arith.constant 0 : i32
    %c0_i32_0 = arith.constant 0 : i32
    return %arg0, %c0_i32 : i32, i32
  }
}

</mosaic_0001>

<bundles_post_ra>
// kernel: tpu_custom_call.1
= control target key start
LH: loop header
LB: loop body
LE: loop exit
PB: predicated region body
PF: predicated region fallthrough
CT: control target
= control target key end

     0   :  { %10 = vsyncpa [#allocation4], 0  ;;  %s576_s0 = inlined_call_operand.hbm [shape: bf16[16,128], index: 0, kind: input, shape index: {}]   ;;  %s577_s1 = inlined_call_operand.hbm [shape: bf16[128,128], index: 1, kind: input, shape index: {}]   ;;  %s578_s2 = inlined_call_operand.vmem [shape: f32[1,128], index: 2, kind: input, shape index: {}]   ;;  %s579_s3 = inlined_call_operand.hbm [shape: bf16[128,128], index: 3, kind: input, shape index: {}]   ;;  %s580_s4 = inlined_call_operand.vmem [shape: f32[1,128], index: 4, kind: input, shape index: {}]   ;;  %s581_s5 = inlined_call_operand.hbm [shape: f32[16,128], index: 5, kind: output, shape index: {}]  }
   0x1   :  { %11 = vsyncpa [#allocation7], 0 }
   0x2   :  { %12 = vsyncpa [#allocation5], 0  ;;  %s518_s18 = smov [#allocation6]   ;;  %s519_s20 = smov [#allocation3]  }
   0x3   :  { %s30_s19 = sshll.u32 %s518_s18, 4  ;;  %s18_s21 = sshll.u32 %s519_s20, 4  ;;  %s31_s19 = int_to_ptr.vmem [resolvable:$true] %s30_s19  ;;  %s19_s21 = int_to_ptr.vmem [resolvable:$true] %s18_s21 }
   0x4   :  { %s440_s22 = scalar_lea.vmem %s31_s19, 1024  ;;  %p445_p1 = scmp.lt.s32.totalorder %s31_s19, %s31_s19 }
   0x5   :  { %p441_p0 = scmp.ne.s32.totalorder %s31_s19, %s440_s22  ;;  %p446_p2 = scmp.lt.s32.totalorder %s440_s22, %s440_s22 }
   0x7   :  { %p447_p3 = por %p446_p2, %p445_p1 }
   0x9   :  { %p448_p4 = pnand %p447_p3, %p441_p0 }
   0xb   :  { %451 = shalt.err (!%p448_p4)
}
   0xc   :  { %s520_s23 = smov 64   ;;  %s521_s24 = smov 4  }
   0xd   :  { %36 = dma.hbm_to_vmem [thread:$0]  %s577_s1, 1024, %s31_s19, [#allocation7], %s520_s23, %s520_s23, %s521_s24  }
   0xe   :  { %s460_s27 = scalar_lea.vmem %s19_s21, 128  ;;  %p465_p6 = scmp.lt.s32.totalorder %s19_s21, %s19_s21 }
   0xf   :  { %p461_p5 = scmp.ne.s32.totalorder %s19_s21, %s460_s27  ;;  %p466_p7 = scmp.lt.s32.totalorder %s460_s27, %s460_s27 }
  0x11   :  { %p467_p8 = por %p466_p7, %p465_p6 }
  0x13   :  { %p468_p9 = pnand %p467_p8, %p461_p5 }
  0x15   :  { %471 = shalt.err (!%p468_p9)
}
  0x16   :  { %24 = dma.hbm_to_vmem [thread:$0]  %s576_s0, 128, %s19_s21, [#allocation4], %s520_s23, %s520_s23, %s521_s24  }
  0x17   :  { %s522_s30 = smov [#allocation8]  }
  0x18   :  { %s44_s6 = sshll.u32 %s522_s30, 4  ;;  %s45_s6 = int_to_ptr.vmem [resolvable:$true] %s44_s6 }
  0x19   :  { %s480_s7 = scalar_lea.vmem %s45_s6, 1024  ;;  %p485_p11 = scmp.lt.s32.totalorder %s45_s6, %s45_s6 }
  0x1a   :  { %p481_p10 = scmp.ne.s32.totalorder %s45_s6, %s480_s7  ;;  %p486_p12 = scmp.lt.s32.totalorder %s480_s7, %s480_s7 }
  0x1c   :  { %p487_p13 = por %p486_p12, %p485_p11 }
  0x1e   :  { %p488_p0 = pnand %p487_p13, %p481_p10 }
  0x20   :  { %491 = shalt.err (!%p488_p0)
}
  0x21   :  { %50 = dma.hbm_to_vmem [thread:$0]  %s579_s3, 1024, %s45_s6, [#allocation7], %s520_s23, %s520_s23, %s521_s24  }
  0x22   :  { %512 = dma.done.wait [#allocation4], 128  }
  0x23   :  { %513 = vsyncadd [#allocation4], 4294967168 }
  0x24   :  { %514 = dma.done.wait [#allocation7], 2048  }
  0x25   :  { %515 = vsyncadd [#allocation7], 4294965248  ;;  %v523_v0 = vmov 0.0   ;;  %vm524_vm0 = vmmov 0   ;;  %v415_v1 = vld [vmem:[#allocation6 + $0x38] sm:$0xff]   ;;  %v416_v2 = vld [vmem:[#allocation6 + $0x30] sm:$0xff]  }
  0x26   :  { %365 = vmatprep.subr.bf16.mxu0 %v523_v0  ;;  %381 = vmatprep.mubr.msk.bf16.mxu0 %vm524_vm0, %v523_v0  ;;  %v417_v3 = vld [vmem:[#allocation6 + $0x28] sm:$0xff]   ;;  %v424_v4 = vld [vmem:[#allocation8 + $0x38] sm:$0xff]   ;;  %v418_v5 = vld [vmem:[#allocation6 + $0x20] sm:$0xff]   ;;  %s525_s11 = smov [#allocation9]  }
  0x27   :  { %385 = vmatprep.subr.bf16.mxu1 %v523_v0  ;;  %401 = vmatprep.mubr.msk.bf16.mxu1 %vm524_vm0, %v523_v0  ;;  %v425_v6 = vld [vmem:[#allocation8 + $0x30] sm:$0xff]   ;;  %v419_v7 = vld [vmem:[#allocation6 + $0x18] sm:$0xff]   ;;  %v426_v8 = vld [vmem:[#allocation8 + $0x28] sm:$0xff]   ;;  %s315_s12 = sshll.u32 %s525_s11, 4  ;;  %s316_s12 = int_to_ptr.vmem [resolvable:$true] %s315_s12 }
  0x28   :  { %366 = vmatpush3.bf16.msra.mxu0 %v415_v1  ;;  %386 = vmatpush3.bf16.msra.mxu1 %v424_v4  ;;  %v420_v9 = vld [vmem:[#allocation6 + $0x10] sm:$0xff]   ;;  %v427_v10 = vld [vmem:[#allocation8 + $0x20] sm:$0xff]   ;;  %v421_v11 = vld [vmem:[#allocation6 + $0x8] sm:$0xff]   ;;  %p497_p2 = scmp.lt.s32.totalorder %s316_s12, %s316_s12 }
  0x29   :  { %367 = vmatprep.subr.bf16.mxu0 %v523_v0  ;;  %387 = vmatprep.subr.bf16.mxu1 %v523_v0  ;;  %v428_v12 = vld [vmem:[#allocation8 + $0x18] sm:$0xff]   ;;  %v422_v13 = vld [vmem:[#allocation6] sm:$0xff]   ;;  %v429_v15 = vld [vmem:[#allocation8 + $0x10] sm:$0xff]  }
  0x2a   :  { %v423_v14 = vld [vmem:[#allocation3] sm:$0xff]   ;;  %v430_v16 = vld [vmem:[#allocation8 + $0x8] sm:$0xff]   ;;  %v431_v17 = vld [vmem:[#allocation8] sm:$0xff]  }
  0x2b   :  { %v329_v18 = vld [vmem:[%s578_s2] ss:$0 sm:$0xff]  ;;  %s492_s2 = scalar_lea.vmem %s316_s12, 256 }
  0x2c   :  { %368 = vmatpush3.bf16.msra.mxu0 %v416_v2  ;;  %388 = vmatpush3.bf16.msra.mxu1 %v425_v6  ;;  %v328_v28 = vld [vmem:[%s580_s4] ss:$0 sm:$0xff]  ;;  %p493_p1 = scmp.ne.s32.totalorder %s316_s12, %s492_s2  ;;  %p498_p3 = scmp.lt.s32.totalorder %s492_s2, %s492_s2 }
  0x2d   :  { %369 = vmatprep.subr.bf16.mxu0 %v523_v0  ;;  %389 = vmatprep.subr.bf16.mxu1 %v523_v0 }
  0x2e   :  { %p499_p4 = por %p498_p3, %p497_p2 }
  0x30   :  { %370 = vmatpush3.bf16.msra.mxu0 %v417_v3  ;;  %390 = vmatpush3.bf16.msra.mxu1 %v426_v8  ;;  %p500_p5 = pnand %p499_p4, %p493_p1 }
  0x31   :  { %371 = vmatprep.subr.bf16.mxu0 %v523_v0  ;;  %391 = vmatprep.subr.bf16.mxu1 %v523_v0 }
  0x34   :  { %372 = vmatpush3.bf16.msra.mxu0 %v418_v5  ;;  %392 = vmatpush3.bf16.msra.mxu1 %v427_v10 }
  0x35   :  { %373 = vmatprep.subr.bf16.mxu0 %v523_v0  ;;  %393 = vmatprep.subr.bf16.mxu1 %v523_v0 }
  0x38   :  { %374 = vmatpush3.bf16.msra.mxu0 %v419_v7  ;;  %394 = vmatpush3.bf16.msra.mxu1 %v428_v12 }
  0x39   :  { %375 = vmatprep.subr.bf16.mxu0 %v523_v0  ;;  %395 = vmatprep.subr.bf16.mxu1 %v523_v0 }
  0x3c   :  { %376 = vmatpush3.bf16.msra.mxu0 %v420_v9  ;;  %396 = vmatpush3.bf16.msra.mxu1 %v429_v15 }
  0x3d   :  { %377 = vmatprep.subr.bf16.mxu0 %v523_v0  ;;  %397 = vmatprep.subr.bf16.mxu1 %v523_v0 }
  0x40   :  { %378 = vmatpush3.bf16.msra.mxu0 %v421_v11  ;;  %398 = vmatpush3.bf16.msra.mxu1 %v430_v16 }
  0x41   :  { %379 = vmatprep.subr.bf16.mxu0 %v523_v0  ;;  %399 = vmatprep.subr.bf16.mxu1 %v523_v0 }
  0x44   :  { %380 = vmatpush3.bf16.msra.mxu0 %v422_v13  ;;  %400 = vmatpush3.bf16.msra.mxu1 %v431_v17 }
  0x47   :  { %382 = vmatmul.mubr.bf16.vlgmr.msra.gmra.mxu0 %v423_v14 }
 0x107   :  { %v185_v19 = vpop.f32.mrf.mxu0 }
 0x108   :  { %v186_v21 = vadd.f32 %v329_v18, %v185_v19 }
 0x109   :  { %v383_v20 = vpop.f32.mrf.mxu0 }
 0x10a   :  { %v192_v25 = vmax.f32 %v186_v21, 0.0 }
 0x10b   :  { %v188_v22 = vpop.f32.mrf.mxu0 }
 0x10c   :  { %v189_v23 = vadd.f32 %v329_v18, %v188_v22 }
 0x10d   :  { %v384_v24 = vpop.f32.mrf.mxu0 }
 0x10e   :  { %v193_v26 = vmax.f32 %v189_v23, 0.0 }
 0x110   :  { %v196_v27 = vpack.c.bf16 %v193_v26, %v192_v25 }
 0x112   :  { %402 = vmatmul.mubr.bf16.vlgmr.msra.gmra.mxu1 %v196_v27 }
 0x1d2   :  { %v295_v29 = vpop.f32.mrf.mxu1 }
 0x1d3   :  { %v302_v30 = vadd.f32 %v328_v28, %v295_v29 }
 0x1d4   :  { %v403_v31 = vpop.f32.mrf.mxu1 }
 0x1d5   :  { %308 = vst [vmem:[#allocation9] sm:$0xff] %v302_v30 }
 0x1d6   :  { %v298_v32 = vpop.f32.mrf.mxu1 }
 0x1d7   :  { %v303_v33 = vadd.f32 %v328_v28, %v298_v32 }
 0x1d8   :  { %v404_v34 = vpop.f32.mrf.mxu1 }
 0x1d9   :  { %309 = vst [vmem:[#allocation9 + $0x8] sm:$0xff] %v303_v33 }
 0x1da   :  { %503 = shalt.err (!%p500_p5)
}
 0x1db   :  { %s526_s13 = smov 128   ;;  %s527_s4 = smov 8  }
 0x1dc   :  { %321 = dma.vmem_to_hbm [thread:$0]  %s316_s12, 256, %s581_s5, [#allocation5], %s526_s13, %s526_s13, %s527_s4  }
 0x1dd   :  { %516 = dma.done.wait [#allocation5], 256  }
 0x1de   :  { %517 = vsyncadd [#allocation5], 4294967040 }
 0x1df   :  { %325 = vsyncpa [#allocation4], 1 }
 0x1e0   :  { %326 = vsyncpa [#allocation7], 1 }
 0x1e1   :  { %327 = vsyncpa [#allocation5], 1 }

</bundles_post_ra>
